<compile_context>
chip_gen: v7x
topology: tpu7x:2x2x1
jax: 0.10.0
libtpu: 0.0.40
codegen_flags: <defaults>
</compile_context>

<pallas_src>
import jax
import jax.numpy as jnp
from jax.experimental import pallas as pl
from jax.experimental.pallas import tpu as pltpu


def qnet_kernel(s_ref, a_ref, w1s_ref, w1a_ref, b1_ref,
                w2_ref, b2_ref, w3_ref, b3_ref, o_ref):
    # s: [TB, S] f32, a: [TB, A] f32; weights bf16, biases f32.
    s = s_ref[...].astype(jnp.bfloat16)
    a = a_ref[...]

    # fc1: concat eliminated -> two contributions.
    h1 = jnp.dot(s, w1s_ref[...], preferred_element_type=jnp.float32)
    if a.shape[-1] == 1:
        # A == 1: VPU broadcast multiply instead of a degenerate K=1 MXU matmul.
        h1 = h1 + a.astype(jnp.float32) * w1a_ref[...].astype(jnp.float32)
    else:
        h1 = h1 + jnp.dot(a.astype(jnp.bfloat16), w1a_ref[...],
                          preferred_element_type=jnp.float32)
    h1 = jnp.maximum(h1 + b1_ref[...], 0.0)                       # relu

    # fc2
    h2 = jnp.dot(h1.astype(jnp.bfloat16), w2_ref[...],
                 preferred_element_type=jnp.float32) + b2_ref[...]
    h2 = jnp.maximum(h2, 0.0)                                     # relu

    # q head (out_features == 1): VPU multiply + lane reduction, lane-dense store.
    q = jnp.sum(h2 * w3_ref[...].astype(jnp.float32), axis=-1)    # [TB]
    o_ref[...] = (q.reshape(1, 1, -1)
                  + b3_ref[...].reshape(1, 1, 1)).astype(o_ref.dtype)


def qnet_forward(state, action, params, *, batch_tile=128):
    """Fused QNet forward.  state: [B, S], action: [B, A] -> q: [B, 1]."""
    w1s, w1a, b1, w2, b2, w3, b3 = params
    B, S = state.shape
    A = action.shape[1]

    n_tiles = pl.cdiv(B, batch_tile)
    b_pad = n_tiles * batch_tile
    if b_pad != B:
        state = jnp.pad(state, ((0, b_pad - B), (0, 0)))
        action = jnp.pad(action, ((0, b_pad - B), (0, 0)))

    def resident(arr):  # full-array block, same block every grid step -> stays in VMEM
        nd = arr.ndim
        return pl.BlockSpec(arr.shape, lambda i, _nd=nd: (0,) * _nd)

    out = pl.pallas_call(
        qnet_kernel,
        out_shape=jax.ShapeDtypeStruct((n_tiles, 1, batch_tile), jnp.float32),
        grid=(n_tiles,),
        in_specs=[
            pl.BlockSpec((batch_tile, S), lambda i: (i, 0)),   # state tile
            pl.BlockSpec((batch_tile, A), lambda i: (i, 0)),   # action tile
            resident(w1s), resident(w1a), resident(b1),
            resident(w2), resident(b2),
            resident(w3), resident(b3),
        ],
        out_specs=pl.BlockSpec((1, 1, batch_tile), lambda i: (i, 0, 0)),
        compiler_params=pltpu.CompilerParams(
            dimension_semantics=("parallel",)),
    )(state, action, w1s, w1a, b1, w2, b2, w3, b3)

    return out.reshape(b_pad, 1)[:B]


def init_qnet_params(key, state_dims, action_dims, fc1_dims=256, fc2_dims=256):
    """PyTorch nn.Linear-style init (U[-1/sqrt(fan_in), 1/sqrt(fan_in)])."""
    d_in = state_dims + action_dims
    ks = jax.random.split(key, 6)

    def lin(kw, kb, fan_in, fan_out):
        bound = 1.0 / jnp.sqrt(jnp.float32(fan_in))
        w = jax.random.uniform(kw, (fan_in, fan_out), jnp.float32, -bound, bound)
        b = jax.random.uniform(kb, (1, fan_out), jnp.float32, -bound, bound)
        return w, b

    w1, b1 = lin(ks[0], ks[1], d_in, fc1_dims)
    w2, b2 = lin(ks[2], ks[3], fc1_dims, fc2_dims)
    w3, b3 = lin(ks[4], ks[5], fc2_dims, 1)

    # Pre-split fc1 weight (no runtime concat) and store matmul weights in bf16.
    w1_s = w1[:state_dims].astype(jnp.bfloat16)        # [S,  F1]
    w1_a = w1[state_dims:].astype(jnp.bfloat16)        # [A,  F1]
    w2 = w2.astype(jnp.bfloat16)                       # [F1, F2]
    w3_row = w3.T.astype(jnp.bfloat16)                 # [1,  F2] row vector for VPU path
    b3 = b3.reshape(1, 1)
    return (w1_s, w1_a, b1, w2, b2, w3_row, b3)


def qnet_reference(state, action, params):
    """Pure-JAX reference mirroring the kernel's bf16/f32 cast chain."""
    w1s, w1a, b1, w2, b2, w3, b3 = params
    s = state.astype(jnp.bfloat16)
    h1 = jnp.dot(s, w1s, preferred_element_type=jnp.float32)
    if action.shape[-1] == 1:
        h1 = h1 + action.astype(jnp.float32) * w1a.astype(jnp.float32)
    else:
        h1 = h1 + jnp.dot(action.astype(jnp.bfloat16), w1a,
                          preferred_element_type=jnp.float32)
    h1 = jnp.maximum(h1 + b1, 0.0)
    h2 = jnp.maximum(jnp.dot(h1.astype(jnp.bfloat16), w2,
                             preferred_element_type=jnp.float32) + b2, 0.0)
    q = jnp.sum(h2 * w3.astype(jnp.float32), axis=-1, keepdims=True) + b3[0, 0]
    return q


if __name__ == "__main__":
    # Pendulum-like sizes: state_dims=3, action_dims=1, batch=2.
    B, S, A = 2, 3, 1
    key = jax.random.PRNGKey(0)
    k_param, k_state, k_action = jax.random.split(key, 3)

    params = init_qnet_params(k_param, S, A)
    state = jax.random.normal(k_state, (B, S), jnp.float32)
    action = jax.random.normal(k_action, (B, A), jnp.float32)

    q = jax.block_until_ready(qnet_forward(state, action, params))
    q_ref = qnet_reference(state, action, params)
    assert q.shape == (B, 1), q.shape
    assert jnp.allclose(q, q_ref, atol=2e-3, rtol=2e-3), (q, q_ref)

    # Replay-buffer-sized batch: exercises padding, the batch grid, and
    # resident-weight BlockSpecs across multiple grid steps.
    B2 = 300
    k_s2, k_a2 = jax.random.split(jax.random.PRNGKey(1))
    state2 = jax.random.normal(k_s2, (B2, S), jnp.float32)
    action2 = jax.random.normal(k_a2, (B2, A), jnp.float32)
    q2 = jax.block_until_ready(qnet_forward(state2, action2, params))
    q2_ref = qnet_reference(state2, action2, params)
    assert q2.shape == (B2, 1), q2.shape
    assert jnp.allclose(q2, q2_ref, atol=2e-3, rtol=2e-3)

    print("KERNEL_OK")
</pallas_src>

<mosaic_0001>
module attributes {stable_mosaic.version = 11 : i64} {
  func.func @qnet_kernel(%arg0: i32, %arg1: memref<128x3xf32, #tpu.memory_space<vmem>>, %arg2: memref<128x1xf32, #tpu.memory_space<vmem>>, %arg3: memref<3x256xbf16, #tpu.memory_space<vmem>>, %arg4: memref<1x256xbf16, #tpu.memory_space<vmem>>, %arg5: memref<1x256xf32, #tpu.memory_space<vmem>>, %arg6: memref<256x256xbf16, #tpu.memory_space<vmem>>, %arg7: memref<1x256xf32, #tpu.memory_space<vmem>>, %arg8: memref<1x256xbf16, #tpu.memory_space<vmem>>, %arg9: memref<1x1xf32, #tpu.memory_space<vmem>>, %arg10: memref<1x1x128xf32, #tpu.memory_space<vmem>>) attributes {dimension_semantics = [#tpu.dimension_semantics<parallel>], iteration_bounds = array<i64: 1>, scalar_prefetch = 0 : i64, scratch_operands = 0 : i64, tpu.core_type = #tpu.core_type<tc>, window_params = [{transform_indices = @transform_0, window_bounds = array<i64: 128, 3>}, {transform_indices = @transform_1, window_bounds = array<i64: 128, 1>}, {pipeline_mode = #tpu.pipeline_mode<synchronous>, transform_indices = @transform_2, window_bounds = array<i64: 3, 256>}, {pipeline_mode = #tpu.pipeline_mode<synchronous>, transform_indices = @transform_3, window_bounds = array<i64: 1, 256>}, {pipeline_mode = #tpu.pipeline_mode<synchronous>, transform_indices = @transform_4, window_bounds = array<i64: 1, 256>}, {pipeline_mode = #tpu.pipeline_mode<synchronous>, transform_indices = @transform_5, window_bounds = array<i64: 256, 256>}, {pipeline_mode = #tpu.pipeline_mode<synchronous>, transform_indices = @transform_6, window_bounds = array<i64: 1, 256>}, {pipeline_mode = #tpu.pipeline_mode<synchronous>, transform_indices = @transform_7, window_bounds = array<i64: 1, 256>}, {pipeline_mode = #tpu.pipeline_mode<synchronous>, transform_indices = @transform_8, window_bounds = array<i64: 1, 1>}, {transform_indices = @transform_9, window_bounds = array<i64: 1, 1, 128>}]} {
    %c0 = arith.constant 0 : index
    %c0_0 = arith.constant 0 : index
    %0 = vector.load %arg1[%c0, %c0_0] : memref<128x3xf32, #tpu.memory_space<vmem>>, vector<128x3xf32>
    %1 = arith.truncf %0 : vector<128x3xf32> to vector<128x3xbf16>
    %c0_1 = arith.constant 0 : index
    %c0_2 = arith.constant 0 : index
    %2 = vector.load %arg2[%c0_1, %c0_2] : memref<128x1xf32, #tpu.memory_space<vmem>>, vector<128x1xf32>
    %c0_3 = arith.constant 0 : index
    %c0_4 = arith.constant 0 : index
    %3 = vector.load %arg3[%c0_3, %c0_4] : memref<3x256xbf16, #tpu.memory_space<vmem>>, vector<3x256xbf16>
    %cst = arith.constant dense<0.000000e+00> : vector<128x256xf32>
    %4 = tpu.matmul %1, %3, %cst {dimension_numbers = #tpu.dot_dimension_numbers<[1], [0], [0], [1], [0, 0, 1, 1], [], []>} : vector<128x3xbf16>, vector<3x256xbf16>, vector<128x256xf32> -> vector<128x256xf32>
    %c0_5 = arith.constant 0 : index
    %c0_6 = arith.constant 0 : index
    %5 = vector.load %arg4[%c0_5, %c0_6] : memref<1x256xbf16, #tpu.memory_space<vmem>>, vector<1x256xbf16>
    %6 = arith.extf %5 : vector<1x256xbf16> to vector<1x256xf32>
    %7 = vector.broadcast %2 : vector<128x1xf32> to vector<128x256xf32>
    %8 = vector.broadcast %6 : vector<1x256xf32> to vector<128x256xf32>
    %9 = arith.mulf %7, %8 : vector<128x256xf32>
    %10 = arith.addf %4, %9 : vector<128x256xf32>
    %c0_7 = arith.constant 0 : index
    %c0_8 = arith.constant 0 : index
    %11 = vector.load %arg5[%c0_7, %c0_8] : memref<1x256xf32, #tpu.memory_space<vmem>>, vector<1x256xf32>
    %12 = vector.broadcast %11 : vector<1x256xf32> to vector<128x256xf32>
    %13 = arith.addf %10, %12 : vector<128x256xf32>
    %cst_9 = arith.constant 0.000000e+00 : f32
    %14 = vector.broadcast %cst_9 : f32 to vector<128x256xf32>
    %15 = arith.maximumf %13, %14 : vector<128x256xf32>
    %16 = arith.truncf %15 : vector<128x256xf32> to vector<128x256xbf16>
    %c0_10 = arith.constant 0 : index
    %c0_11 = arith.constant 0 : index
    %17 = vector.load %arg6[%c0_10, %c0_11] : memref<256x256xbf16, #tpu.memory_space<vmem>>, vector<256x256xbf16>
    %cst_12 = arith.constant dense<0.000000e+00> : vector<128x256xf32>
    %18 = tpu.matmul %16, %17, %cst_12 {dimension_numbers = #tpu.dot_dimension_numbers<[1], [0], [0], [1], [0, 0, 1, 1], [], []>} : vector<128x256xbf16>, vector<256x256xbf16>, vector<128x256xf32> -> vector<128x256xf32>
    %c0_13 = arith.constant 0 : index
    %c0_14 = arith.constant 0 : index
    %19 = vector.load %arg7[%c0_13, %c0_14] : memref<1x256xf32, #tpu.memory_space<vmem>>, vector<1x256xf32>
    %20 = vector.broadcast %19 : vector<1x256xf32> to vector<128x256xf32>
    %21 = arith.addf %18, %20 : vector<128x256xf32>
    %cst_15 = arith.constant 0.000000e+00 : f32
    %22 = vector.broadcast %cst_15 : f32 to vector<128x256xf32>
    %23 = arith.maximumf %21, %22 : vector<128x256xf32>
    %c0_16 = arith.constant 0 : index
    %c0_17 = arith.constant 0 : index
    %24 = vector.load %arg8[%c0_16, %c0_17] : memref<1x256xbf16, #tpu.memory_space<vmem>>, vector<1x256xbf16>
    %25 = arith.extf %24 : vector<1x256xbf16> to vector<1x256xf32>
    %26 = vector.broadcast %25 : vector<1x256xf32> to vector<128x256xf32>
    %27 = arith.mulf %23, %26 : vector<128x256xf32>
    %cst_18 = arith.constant dense<0.000000e+00> : vector<128xf32>
    %28 = vector.multi_reduction <add>, %27, %cst_18 [1] : vector<128x256xf32> to vector<128xf32>
    %29 = vector.shape_cast %28 : vector<128xf32> to vector<1x1x128xf32>
    %c0_19 = arith.constant 0 : index
    %c0_20 = arith.constant 0 : index
    %30 = vector.load %arg9[%c0_19, %c0_20] : memref<1x1xf32, #tpu.memory_space<vmem>>, vector<1x1xf32>
    %31 = vector.shape_cast %30 : vector<1x1xf32> to vector<1x1x1xf32>
    %32 = vector.broadcast %31 : vector<1x1x1xf32> to vector<1x1x128xf32>
    %33 = arith.addf %29, %32 : vector<1x1x128xf32>
    %c0_21 = arith.constant 0 : index
    %c0_22 = arith.constant 0 : index
    %c0_23 = arith.constant 0 : index
    %34 = vector.load %arg10[%c0_21, %c0_22, %c0_23] : memref<1x1x128xf32, #tpu.memory_space<vmem>>, vector<1x1x128xf32>
    tpu.vector_store %arg10[%c0_21, %c0_22, %c0_23], %33 {strides = array<i32>} : memref<1x1x128xf32, #tpu.memory_space<vmem>>, vector<1x1x128xf32>,
    return
  }
  func.func @transform_0(%arg0: i32) -> (i32, i32) {
    %c0_i32 = arith.constant 0 : i32
    %c0_i32_0 = arith.constant 0 : i32
    return %arg0, %c0_i32 : i32, i32
  }
  func.func @transform_1(%arg0: i32) -> (i32, i32) {
    %c0_i32 = arith.constant 0 : i32
    %c0_i32_0 = arith.constant 0 : i32
    return %arg0, %c0_i32 : i32, i32
  }
  func.func @transform_2(%arg0: i32) -> (i32, i32) {
    %c0_i32 = arith.constant 0 : i32
    %c0_i32_0 = arith.constant 0 : i32
    %c0_i32_1 = arith.constant 0 : i32
    return %c0_i32, %c0_i32_0 : i32, i32
  }
  func.func @transform_3(%arg0: i32) -> (i32, i32) {
    %c0_i32 = arith.constant 0 : i32
    %c0_i32_0 = arith.constant 0 : i32
    %c0_i32_1 = arith.constant 0 : i32
    return %c0_i32, %c0_i32_0 : i32, i32
  }
  func.func @transform_4(%arg0: i32) -> (i32, i32) {
    %c0_i32 = arith.constant 0 : i32
    %c0_i32_0 = arith.constant 0 : i32
    %c0_i32_1 = arith.constant 0 : i32
    return %c0_i32, %c0_i32_0 : i32, i32
  }
  func.func @transform_5(%arg0: i32) -> (i32, i32) {
    %c0_i32 = arith.constant 0 : i32
    %c0_i32_0 = arith.constant 0 : i32
    %c0_i32_1 = arith.constant 0 : i32
    return %c0_i32, %c0_i32_0 : i32, i32
  }
  func.func @transform_6(%arg0: i32) -> (i32, i32) {
    %c0_i32 = arith.constant 0 : i32
    %c0_i32_0 = arith.constant 0 : i32
    %c0_i32_1 = arith.constant 0 : i32
    return %c0_i32, %c0_i32_0 : i32, i32
  }
  func.func @transform_7(%arg0: i32) -> (i32, i32) {
    %c0_i32 = arith.constant 0 : i32
    %c0_i32_0 = arith.constant 0 : i32
    %c0_i32_1 = arith.constant 0 : i32
    return %c0_i32, %c0_i32_0 : i32, i32
  }
  func.func @transform_8(%arg0: i32) -> (i32, i32) {
    %c0_i32 = arith.constant 0 : i32
    %c0_i32_0 = arith.constant 0 : i32
    %c0_i32_1 = arith.constant 0 : i32
    return %c0_i32, %c0_i32_0 : i32, i32
  }
  func.func @transform_9(%arg0: i32) -> (i32, i32, i32) {
    %c0_i32 = arith.constant 0 : i32
    %c0_i32_0 = arith.constant 0 : i32
    %c0_i32_1 = arith.constant 0 : i32
    return %arg0, %c0_i32, %c0_i32_0 : i32, i32, i32
  }
}

</mosaic_0001>

<bundles_post_ra>
// kernel: tpu_custom_call.1
= control target key start
LH: loop header
LB: loop body
LE: loop exit
PB: predicated region body
PF: predicated region fallthrough
CT: control target
= control target key end

     0   :  { %s1768_s0 = inlined_call_operand.vmem [shape: f32[128,3], index: 0, kind: input, shape index: {}]   ;;  %s1769_s1 = inlined_call_operand.vmem [shape: f32[128,1], index: 1, kind: input, shape index: {}]   ;;  %s1770_s2 = inlined_call_operand.vmem [shape: bf16[3,256], index: 2, kind: input, shape index: {}]   ;;  %s1771_s3 = inlined_call_operand.vmem [shape: bf16[1,256], index: 3, kind: input, shape index: {}]   ;;  %s1772_s4 = inlined_call_operand.vmem [shape: f32[1,256], index: 4, kind: input, shape index: {}]   ;;  %s1773_s5 = inlined_call_operand.vmem [shape: bf16[256,256], index: 5, kind: input, shape index: {}]   ;;  %s1774_s6 = inlined_call_operand.vmem [shape: f32[1,256], index: 6, kind: input, shape index: {}]   ;;  %s1775_s7 = inlined_call_operand.vmem [shape: bf16[1,256], index: 7, kind: input, shape index: {}]   ;;  %s1776_s8 = inlined_call_operand.<no memory space> [shape: f32[1,1], index: 8, kind: input, shape index: {}]   ;;  %s1777_s9 = inlined_call_operand.hbm [shape: f32[1,1,128], index: 9, kind: output, shape index: {}]  }
   0x1   :  { %v14_v0 = vstv %s1776_s8 }
   0x2   :  { %15 = vst [vmem:[#allocation2] sm:$0x1] %v14_v0 }
   0x3   :  { %v1078_v1 = vld.sshfl [vmem:[%s1770_s2] sm:$0x33 pattern:$0x76325410]  ;;  %vm244_vm0 = vcmask 1040384   ;;  %vm245_vm1 = vcmask 1041408  }
   0x4   :  { %v218_v2 = vcombine.high %v1078_v1, %v1078_v1  ;;  %v1228_v3 = vmov 65535   ;;  %v1229_v5 = vmov 0   ;;  %v36_v7 = vld [vmem:[%s1768_s0] sm:$0xff]  ;;  %v37_v8 = vld [vmem:[%s1768_s0 + $0x8] sm:$0xff]  ;;  %v66_v11 = vld [vmem:[%s1769_s1 + $0x30] sm:$0xff]  ;;  %vm219_vm2 = vcmask 23552  }
   0x5   :  { %v246_v4 = vsel %vm244_vm0, 4294967295, %v1228_v3  ;;  %286 = vmatprep.mubr.bf16.mxu0 %v1229_v5  ;;  %1155 = vset.pattern.permute.xlu1 %v1229_v5  ;;  %v52_v12 = vpack.c.bf16 %v37_v8, %v36_v7  ;;  %v60_v13 = vld [vmem:[%s1769_s1] sm:$0xff]  ;;  %v67_v14 = vld [vmem:[%s1769_s1 + $0x38] sm:$0xff]  ;;  %v61_v15 = vld [vmem:[%s1769_s1 + $0x8] sm:$0xff] }
   0x6   :  { %v247_v6 = vsel %vm245_vm1, %v246_v4, 0  ;;  %1154 = vset.pattern.permute.xlu0 %v1229_v5  ;;  %81 = vperm.xlu1 %1155, %v60_v13   ;;  %v38_v16 = vld [vmem:[%s1768_s0 + $0x10] sm:$0xff]  ;;  %v39_v17 = vld [vmem:[%s1768_s0 + $0x18] sm:$0xff]  ;;  %v68_v18 = vld [vmem:[%s1769_s1 + $0x40] sm:$0xff] }
   0x7   :  { %v252_v9 = vand.u32 %v247_v6, %v218_v2  ;;  %v249_v10 = vand.u32 %v1078_v1, %v247_v6  ;;  %111 = vperm.xlu0 %1154, %v66_v11   ;;  %v69_v19 = vld [vmem:[%s1769_s1 + $0x48] sm:$0xff]  ;;  %v53_v22 = vpack.c.bf16 %v39_v17, %v38_v16  ;;  %v1161_v23 = vld [vmem:[%s1773_s5 + $0x14] ss:$8 sps:$4 sm:$0xff]   ;;  %v1159_v26 = vld [vmem:[%s1773_s5 + $0x10] ss:$8 sps:$4 sm:$0xff]  }
   0x8   :  { %v1156_v20 = vld [vmem:[%s1773_s5] ss:$8 sps:$4 sm:$0xff]   ;;  %v1158_v21 = vld [vmem:[%s1773_s5 + $0x4] ss:$8 sps:$4 sm:$0xff]   ;;  %v62_v24 = vld [vmem:[%s1769_s1 + $0x10] sm:$0xff] }
   0x9   :  { %254 = vmatprep.subr.bf16.mxu0 %v252_v9  ;;  %v63_v25 = vld [vmem:[%s1769_s1 + $0x18] sm:$0xff]  ;;  %1119 = vmatprep.subr.bf16.mxu1 %v1158_v21  ;;  %v1164_v27 = vld [vmem:[%s1773_s5 + $0x24] ss:$8 sps:$4 sm:$0xff]   ;;  %v70_v30 = vld [vmem:[%s1769_s1 + $0x50] sm:$0xff] }
   0xa   :  { %255 = vmatpush1.bf16.msra.mxu0 %v249_v10  ;;  %86 = vperm.xlu1 %1155, %v61_v15   ;;  %v40_v28 = vld [vmem:[%s1768_s0 + $0x20] sm:$0xff]  ;;  %v41_v29 = vld [vmem:[%s1768_s0 + $0x28] sm:$0xff]  ;;  %v71_v31 = vld [vmem:[%s1769_s1 + $0x58] sm:$0xff] }
   0xb   :  { %116 = vperm.xlu0 %1154, %v67_v14   ;;  %663 = vmatprep.subr.bf16.mxu0 %v1158_v21  ;;  %v1162_v32 = vld [vmem:[%s1773_s5 + $0x20] ss:$8 sps:$4 sm:$0xff]   ;;  %v1167_v33 = vld [vmem:[%s1773_s5 + $0x34] ss:$8 sps:$4 sm:$0xff]   ;;  %v54_v34 = vpack.c.bf16 %v41_v29, %v40_v28  ;;  %v1165_v37 = vld [vmem:[%s1773_s5 + $0x30] ss:$8 sps:$4 sm:$0xff]  }
   0xc   :  { %1135 = vmatpush1.bf16.msra.mxu1 %v1156_v20  ;;  %v64_v35 = vld [vmem:[%s1769_s1 + $0x20] sm:$0xff]  ;;  %v65_v36 = vld [vmem:[%s1769_s1 + $0x28] sm:$0xff]  ;;  %v42_v38 = vld [vmem:[%s1768_s0 + $0x30] sm:$0xff] }
   0xd   :  { %1079 = vmatmul.mubr.msk.bf16.vlgmr.msra.gmra.mrb[0].mxu0 %vm219_vm2, %v52_v12  ;;  %1120 = vmatprep.subr.bf16.mxu1 %v1161_v23  ;;  %v43_v39 = vld [vmem:[%s1768_s0 + $0x38] sm:$0xff]  ;;  %v1170_v40 = vld [vmem:[%s1773_s5 + $0x44] ss:$8 sps:$4 sm:$0xff]   ;;  %v1168_v43 = vld [vmem:[%s1773_s5 + $0x40] ss:$8 sps:$4 sm:$0xff]  }
   0xe   :  { %296 = vmatprep.mubr.bf16.mxu0 %v1229_v5  ;;  %126 = vperm.xlu1 %1155, %v69_v19   ;;  %v72_v41 = vld [vmem:[%s1769_s1 + $0x60] sm:$0xff]  ;;  %v73_v42 = vld [vmem:[%s1769_s1 + $0x68] sm:$0xff]  ;;  %v1173_v44 = vld [vmem:[%s1773_s5 + $0x54] ss:$8 sps:$4 sm:$0xff]   ;;  %v55_v45 = vpack.c.bf16 %v43_v39, %v42_v38 }
   0xf   :  { %121 = vperm.xlu0 %1154, %v68_v18   ;;  %664 = vmatpush1.bf16.msra.mxu0 %v1156_v20 }
  0x10   :  { %665 = vmatprep.subr.bf16.mxu0 %v1161_v23  ;;  %1136 = vmatpush1.bf16.msra.mxu1 %v1159_v26 }
  0x11   :  { %1121 = vmatprep.subr.bf16.mxu1 %v1164_v27 }
  0x12   :  { %96 = vperm.xlu1 %1155, %v63_v25  }
  0x13   :  { %91 = vperm.xlu0 %1154, %v62_v24   ;;  %666 = vmatpush1.bf16.msra.mxu0 %v1159_v26 }
  0x14   :  { %667 = vmatprep.subr.bf16.mxu0 %v1164_v27  ;;  %1137 = vmatpush1.bf16.msra.mxu1 %v1162_v32 }
  0x15   :  { %1080 = vmatmul.mubr.msk.bf16.gmra.mrb[4].mxu0 %vm219_vm2, %v53_v22  ;;  %1122 = vmatprep.subr.bf16.mxu1 %v1167_v33 }
  0x16   :  { %306 = vmatprep.mubr.bf16.mxu0 %v1229_v5  ;;  %136 = vperm.xlu1 %1155, %v71_v31  }
  0x17   :  { %131 = vperm.xlu0 %1154, %v70_v30   ;;  %668 = vmatpush1.bf16.msra.mxu0 %v1162_v32 }
  0x18   :  { %669 = vmatprep.subr.bf16.mxu0 %v1167_v33  ;;  %1138 = vmatpush1.bf16.msra.mxu1 %v1165_v37 }
  0x19   :  { %1123 = vmatprep.subr.bf16.mxu1 %v1170_v40 }
  0x1a   :  { %106 = vperm.xlu1 %1155, %v65_v36  }
  0x1b   :  { %101 = vperm.xlu0 %1154, %v64_v35   ;;  %670 = vmatpush1.bf16.msra.mxu0 %v1165_v37 }
  0x1c   :  { %671 = vmatprep.subr.bf16.mxu0 %v1170_v40 }
  0x1d   :  { %1081 = vmatmul.mubr.msk.bf16.gmra.mrb[8].mxu0 %vm219_vm2, %v54_v34 }
  0x1e   :  { %316 = vmatprep.mubr.bf16.mxu0 %v1229_v5 }
  0x1f   :  { %141 = vperm.xlu0 %1154, %v72_v41  }
  0x20   :  { %16 = vsyncpa [#allocation4], 0  ;;  %146 = vperm.xlu1 %1155, %v73_v42   ;;  %v74_v46 = vld [vmem:[%s1769_s1 + $0x70] sm:$0xff]  ;;  %v75_v47 = vld [vmem:[%s1769_s1 + $0x78] sm:$0xff]  ;;  %672 = vmatpush1.bf16.msra.mxu0 %v1168_v43  ;;  %v160_v17 = vlaneseq  ;;  %vm962_vm3 = vcmask 130112   ;;  %vm969_vm4 = vcmask 195712  }
  0x21   :  { %v1171_v48 = vld [vmem:[%s1773_s5 + $0x50] ss:$8 sps:$4 sm:$0xff]   ;;  %673 = vmatprep.subr.bf16.mxu0 %v1173_v44  ;;  %v1176_v49 = vld [vmem:[%s1773_s5 + $0x64] ss:$8 sps:$4 sm:$0xff]   ;;  %1139 = vmatpush1.bf16.msra.mxu1 %v1168_v43  ;;  %v1174_v52 = vld [vmem:[%s1773_s5 + $0x60] ss:$8 sps:$4 sm:$0xff]  }
  0x22   :  { %v44_v50 = vld [vmem:[%s1768_s0 + $0x40] sm:$0xff]  ;;  %v45_v51 = vld [vmem:[%s1768_s0 + $0x48] sm:$0xff]  ;;  %1124 = vmatprep.subr.bf16.mxu1 %v1173_v44  ;;  %v1179_v53 = vld [vmem:[%s1773_s5 + $0x74] ss:$8 sps:$4 sm:$0xff]   ;;  %v1498_v18 = vshrl.u32 %v160_v17, 7  ;;  %vm976_vm5 = vcmask 261312  }
  0x23   :  { %151 = vperm.xlu0 %1154, %v74_v46   ;;  %v56_v54 = vpack.c.bf16 %v45_v51, %v44_v50  ;;  %v1177_v55 = vld [vmem:[%s1773_s5 + $0x70] ss:$8 sps:$4 sm:$0xff]   ;;  %v1182_v56 = vld [vmem:[%s1773_s5 + $0x84] ss:$8 sps:$4 sm:$0xff]   ;;  %v1180_v59 = vld [vmem:[%s1773_s5 + $0x80] ss:$8 sps:$4 sm:$0xff]  }
  0x24   :  { %156 = vperm.xlu1 %1155, %v75_v47   ;;  %674 = vmatpush1.bf16.msra.mxu0 %v1171_v48  ;;  %v46_v57 = vld [vmem:[%s1768_s0 + $0x50] sm:$0xff]  ;;  %v47_v58 = vld [vmem:[%s1768_s0 + $0x58] sm:$0xff]  ;;  %v1188_v63 = vld [vmem:[%s1773_s5 + $0xa4] ss:$8 sps:$4 sm:$0xff]   ;;  %v1506_v22 = vsub.s32 0, %v1498_v18  ;;  %v166_v24 = vsub.s32 2, %v1498_v18 }
  0x25   :  { %1082 = vmatmul.mubr.msk.bf16.gmra.mrb[12].mxu0 %vm219_vm2, %v55_v45  ;;  %675 = vmatprep.subr.bf16.mxu0 %v1176_v49  ;;  %v1185_v60 = vld [vmem:[%s1773_s5 + $0x94] ss:$8 sps:$4 sm:$0xff]   ;;  %v57_v61 = vpack.c.bf16 %v47_v58, %v46_v57  ;;  %v1183_v62 = vld [vmem:[%s1773_s5 + $0x90] ss:$8 sps:$4 sm:$0xff]   ;;  %v48_v0 = vld [vmem:[%s1768_s0 + $0x60] sm:$0xff]  ;;  %v375_v33 = vsub.s32 1, %v1498_v18 }
  0x26   :  { %326 = vmatprep.mubr.bf16.mxu0 %v1229_v5  ;;  %1140 = vmatpush1.bf16.msra.mxu1 %v1171_v48  ;;  %v49_v1 = vld [vmem:[%s1768_s0 + $0x68] sm:$0xff]  ;;  %v1191_v3 = vld [vmem:[%s1773_s5 + $0xb4] ss:$8 sps:$4 sm:$0xff]   ;;  %v1189_v6 = vld [vmem:[%s1773_s5 + $0xb0] ss:$8 sps:$4 sm:$0xff]   ;;  %vm983_vm6 = vcmask 326912  }
  0x27   :  { %1125 = vmatprep.subr.bf16.mxu1 %v1176_v49  ;;  %v1186_v2 = vld [vmem:[%s1773_s5 + $0xa0] ss:$8 sps:$4 sm:$0xff]   ;;  %v58_v4 = vpack.c.bf16 %v49_v1, %v48_v0  ;;  %v1194_v7 = vld [vmem:[%s1773_s5 + $0xc4] ss:$8 sps:$4 sm:$0xff]   ;;  %v50_v8 = vld [vmem:[%s1768_s0 + $0x70] sm:$0xff]  ;;  %vm990_vm7 = vcmask 392512  }
  0x28   :  { %676 = vmatpush1.bf16.msra.mxu0 %v1174_v52  ;;  %v51_v9 = vld [vmem:[%s1768_s0 + $0x78] sm:$0xff]  ;;  %v1192_v10 = vld [vmem:[%s1773_s5 + $0xc0] ss:$8 sps:$4 sm:$0xff]   ;;  %v1200_v13 = vld [vmem:[%s1773_s5 + $0xe4] ss:$8 sps:$4 sm:$0xff]   ;;  %vm997_vm8 = vcmask 458112  }
  0x29   :  { %677 = vmatprep.subr.bf16.mxu0 %v1179_v53  ;;  %v59_v11 = vpack.c.bf16 %v51_v9, %v50_v8  ;;  %v1195_v12 = vld [vmem:[%s1773_s5 + $0xd0] ss:$8 sps:$4 sm:$0xff]   ;;  %v1198_v14 = vld [vmem:[%s1773_s5 + $0xe0] ss:$8 sps:$4 sm:$0xff]   ;;  %v1203_v15 = vld [vmem:[%s1773_s5 + $0xf4] ss:$8 sps:$4 sm:$0xff]  }
  0x2a   :  { %1141 = vmatpush1.bf16.msra.mxu1 %v1174_v52  ;;  %v1201_v16 = vld [vmem:[%s1773_s5 + $0xf0] ss:$8 sps:$4 sm:$0xff]   ;;  %v77_v19 = vld [vmem:[%s1771_s3] sm:$0x3]  ;;  %vm1004_vm9 = vcmask 523712   ;;  %vm1011_vm10 = vcmask 589312  }
  0x2b   :  { %1126 = vmatprep.subr.bf16.mxu1 %v1179_v53  ;;  %v78_v21 = vunpack.c.l.bf16 %v77_v19  ;;  %v367_v32 = vld [vmem:[%s1772_s4] sm:$0x3]  ;;  %vm1018_vm11 = vcmask 654912   ;;  %vm1025_vm12 = vcmask 720512   ;;  %vm1032_vm13 = vcmask 786112  }
  0x2c   :  { %678 = vmatpush1.bf16.msra.mxu0 %v1177_v55  ;;  %v1530_v36 = vrot.slane %v367_v32, %v1506_v22  ;;  %v1535_v39 = vrot.slane %v367_v32, %v375_v33  ;;  %vm1039_vm14 = vcmask 851712   ;;  %vm1046_vm15 = vcmask 917312  }
  0x2d   :  { %1083 = vmatmul.mubr.msk.bf16.gmra.mrb[16].mxu0 %vm219_vm2, %v56_v54  ;;  %679 = vmatprep.subr.bf16.mxu0 %v1182_v56  ;;  %v163_v25 = vrot.slane %v78_v21, %v1506_v22  ;;  %v167_v27 = vrot.slane %v78_v21, %v166_v24  ;;  %vm1053_vm0 = vcmask 982912   ;;  %vm1060_vm1 = vcmask 1048512  }
  0x2e   :  { %336 = vmatprep.mubr.bf16.mxu0 %v1229_v5  ;;  %1142 = vmatpush1.bf16.msra.mxu1 %v1177_v55 }
  0x2f   :  { %1127 = vmatprep.subr.bf16.mxu1 %v1182_v56  ;;  %v1515_v29 = vrot.slane %v163_v25, %v1506_v22  ;;  %v1518_v30 = vrot.slane %v167_v27, %v1506_v22 }
  0x30   :  { %680 = vmatpush1.bf16.msra.mxu0 %v1180_v59 }
  0x31   :  { %681 = vmatprep.subr.bf16.mxu0 %v1185_v60 }
  0x32   :  { %1143 = vmatpush1.bf16.msra.mxu1 %v1180_v59 }
  0x33   :  { %1128 = vmatprep.subr.bf16.mxu1 %v1185_v60 }
  0x34   :  { %682 = vmatpush1.bf16.msra.mxu0 %v1183_v62 }
  0x35   :  { %1084 = vmatmul.mubr.msk.bf16.gmra.mrb[20].mxu0 %vm219_vm2, %v57_v61  ;;  %683 = vmatprep.subr.bf16.mxu0 %v1188_v63 }
  0x36   :  { %346 = vmatprep.mubr.bf16.mxu0 %v1229_v5  ;;  %1144 = vmatpush1.bf16.msra.mxu1 %v1183_v62 }
  0x37   :  { %1129 = vmatprep.subr.bf16.mxu1 %v1188_v63 }
  0x38   :  { %684 = vmatpush1.bf16.msra.mxu0 %v1186_v2 }
  0x39   :  { %685 = vmatprep.subr.bf16.mxu0 %v1191_v3 }
  0x3a   :  { %1145 = vmatpush1.bf16.msra.mxu1 %v1186_v2 }
  0x3b   :  { %1130 = vmatprep.subr.bf16.mxu1 %v1191_v3 }
  0x3c   :  { %686 = vmatpush1.bf16.msra.mxu0 %v1189_v6 }
  0x3d   :  { %1085 = vmatmul.mubr.msk.bf16.gmra.mrb[24].mxu0 %vm219_vm2, %v58_v4  ;;  %687 = vmatprep.subr.bf16.mxu0 %v1194_v7 }
  0x3e   :  { %356 = vmatprep.mubr.bf16.mxu0 %v1229_v5  ;;  %1146 = vmatpush1.bf16.msra.mxu1 %v1189_v6  ;;  %v1197_v5 = vld [vmem:[%s1773_s5 + $0xd4] ss:$8 sps:$4 sm:$0xff]  }
  0x3f   :  { %1131 = vmatprep.subr.bf16.mxu1 %v1194_v7 }
  0x40   :  { %688 = vmatpush1.bf16.msra.mxu0 %v1192_v10 }
  0x41   :  { %689 = vmatprep.subr.bf16.mxu0 %v1197_v5 }
  0x42   :  { %1147 = vmatpush1.bf16.msra.mxu1 %v1192_v10 }
  0x43   :  { %1132 = vmatprep.subr.bf16.mxu1 %v1197_v5 }
  0x44   :  { %690 = vmatpush1.bf16.msra.mxu0 %v1195_v12 }
  0x45   :  { %1086 = vmatmul.mubr.msk.bf16.gmra.mrb[28].mxu0 %vm219_vm2, %v59_v11  ;;  %691 = vmatprep.subr.bf16.mxu0 %v1200_v13 }
  0x46   :  { %1148 = vmatpush1.bf16.msra.mxu1 %v1195_v12 }
  0x47   :  { %1133 = vmatprep.subr.bf16.mxu1 %v1200_v13 }
  0x48   :  { %692 = vmatpush1.bf16.msra.mxu0 %v1198_v14 }
  0x49   :  { %693 = vmatprep.subr.bf16.mxu0 %v1203_v15 }
  0x4a   :  { %1149 = vmatpush1.bf16.msra.mxu1 %v1198_v14 }
  0x4b   :  { %1134 = vmatprep.subr.bf16.mxu1 %v1203_v15 }
  0x4c   :  { %694 = vmatpush1.bf16.msra.mxu0 %v1201_v16 }
  0x4e   :  { %1150 = vmatpush1.bf16.msra.mxu1 %v1201_v16 }
  0x85   :  { %v82_v23 = vpop.permute.xlu1 %81 }
  0x86   :  { %v1503_v20 = vpop.permute.xlu0 %111  ;;  %v178_v34 = vmul.f32 %v1515_v29, %v82_v23  ;;  %v179_v37 = vmul.f32 %v1518_v30, %v82_v23 }
  0x89   :  { %v87_v28 = vpop.permute.xlu1 %86 }
  0x8a   :  { %v1510_v26 = vpop.permute.xlu0 %116  ;;  %v180_v40 = vmul.f32 %v1515_v29, %v87_v28  ;;  %v181_v43 = vmul.f32 %v1518_v30, %v87_v28 }
  0x8d   :  { %v1527_v35 = vpop.permute.xlu1 %126 }
  0x8e   :  { %v1520_v31 = vpop.permute.xlu0 %121 }
  0x91   :  { %v97_v50 = vpop.permute.xlu1 %96 }
  0x92   :  { %v92_v44 = vpop.permute.xlu0 %91  ;;  %v184_v63 = vmul.f32 %v1515_v29, %v97_v50  ;;  %v185_v3 = vmul.f32 %v1518_v30, %v97_v50 }
  0x93   :  { %v182_v55 = vmul.f32 %v1515_v29, %v92_v44  ;;  %v183_v58 = vmul.f32 %v1518_v30, %v92_v44 }
  0x95   :  { %v1549_v4 = vpop.permute.xlu1 %136 }
  0x96   :  { %v1545_v59 = vpop.permute.xlu0 %131 }
  0x99   :  { %v107_v25 = vpop.permute.xlu1 %106 }
  0x9a   :  { %v102_v14 = vpop.permute.xlu0 %101 }
  0x9b   :  { %v186_v16 = vmul.f32 %v1515_v29, %v102_v14  ;;  %v187_v23 = vmul.f32 %v1518_v30, %v102_v14 }
  0xe0   :  { %v288_v38 = vpop.f32.mrb[0].mxu0 }
  0xe1   :  { %v289_v41 = vadd.f32 %v288_v38, %v178_v34  ;;  %v290_v42 = vpop.f32.mrb[1].mxu0  ;;  %v188_v34 = vmul.f32 %v1515_v29, %v107_v25 }
  0xe2   :  { %v291_v45 = vadd.f32 %v290_v42, %v179_v37  ;;  %v292_v46 = vpop.f32.mrb[2].mxu0 }
  0xe3   :  { %v379_v47 = vadd.f32 %v1530_v36, %v289_v41  ;;  %v293_v48 = vadd.f32 %v292_v46, %v180_v40  ;;  %v294_v49 = vpop.f32.mrb[3].mxu0  ;;  %v189_v41 = vmul.f32 %v1518_v30, %v107_v25 }
  0xe4   :  { %v380_v51 = vadd.f32 %v1535_v39, %v291_v45  ;;  %v295_v52 = vadd.f32 %v294_v49, %v181_v43 }
  0xe5   :  { %v381_v53 = vadd.f32 %v1530_v36, %v293_v48  ;;  %v411_v56 = vmax.f32 %v379_v47, 0.0 }
  0xe6   :  { %v382_v54 = vadd.f32 %v1535_v39, %v295_v52  ;;  %v412_v60 = vmax.f32 %v380_v51, 0.0  ;;  %v190_v52 = vmul.f32 %v1515_v29, %v1503_v20 }
  0xe7   :  { %v413_v57 = vmax.f32 %v381_v53, 0.0 }
  0xe8   :  { %v414_v61 = vmax.f32 %v382_v54, 0.0  ;;  %v298_v62 = vpop.f32.mrb[4].mxu0 }
  0xe9   :  { %v443_v0 = vpack.c.bf16 %v413_v57, %v411_v56  ;;  %v299_v1 = vadd.f32 %v298_v62, %v182_v55  ;;  %v300_v2 = vpop.f32.mrb[5].mxu0  ;;  %v191_v55 = vmul.f32 %v1518_v30, %v1503_v20 }
  0xea   :  { %v301_v6 = vadd.f32 %v300_v2, %v183_v58  ;;  %v302_v7 = vpop.f32.mrb[6].mxu0  ;;  %v444_v8 = vpack.c.bf16 %v414_v61, %v412_v60  ;;  %v192_v60 = vmul.f32 %v1515_v29, %v1510_v26 }
  0xeb   :  { %v383_v9 = vadd.f32 %v1530_v36, %v299_v1  ;;  %v303_v10 = vadd.f32 %v302_v7, %v184_v63  ;;  %v304_v11 = vpop.f32.mrb[7].mxu0 }
  0xec   :  { %v384_v5 = vadd.f32 %v1535_v39, %v301_v6  ;;  %v305_v12 = vadd.f32 %v304_v11, %v185_v3  ;;  %695 = vmatprep.mubr.bf16.mxu0 %v444_v8 }
  0xed   :  { %v385_v13 = vadd.f32 %v1530_v36, %v303_v10  ;;  %696 = vmatmul.mubr.bf16.vlgmr.msra.gmra.mrb[32].mxu0 %v443_v0  ;;  %v415_v19 = vmax.f32 %v383_v9, 0.0  ;;  %v193_v0 = vmul.f32 %v1518_v30, %v1510_v26 }
  0xee   :  { %v386_v15 = vadd.f32 %v1535_v39, %v305_v12  ;;  %v416_v27 = vmax.f32 %v384_v5, 0.0  ;;  %v194_v5 = vmul.f32 %v1515_v29, %v1520_v31 }
  0xef   :  { %v417_v21 = vmax.f32 %v385_v13, 0.0  ;;  %v195_v13 = vmul.f32 %v1518_v30, %v1520_v31 }
  0xf0   :  { %v418_v28 = vmax.f32 %v386_v15, 0.0  ;;  %v308_v32 = vpop.f32.mrb[8].mxu0 }
  0xf1   :  { %v309_v37 = vadd.f32 %v308_v32, %v186_v16  ;;  %v310_v38 = vpop.f32.mrb[9].mxu0  ;;  %v445_v40 = vpack.c.bf16 %v417_v21, %v415_v19  ;;  %v196_v19 = vmul.f32 %v1515_v29, %v1527_v35 }
  0xf2   :  { %v311_v42 = vadd.f32 %v310_v38, %v187_v23  ;;  %v312_v43 = vpop.f32.mrb[10].mxu0  ;;  %v446_v44 = vpack.c.bf16 %v418_v28, %v416_v27  ;;  %v197_v27 = vmul.f32 %v1518_v30, %v1527_v35 }
  0xf3   :  { %v387_v45 = vadd.f32 %v1530_v36, %v309_v37  ;;  %v313_v46 = vadd.f32 %v312_v43, %v188_v34  ;;  %v314_v47 = vpop.f32.mrb[11].mxu0 }
  0xf4   :  { %v388_v48 = vadd.f32 %v1535_v39, %v311_v42  ;;  %v315_v49 = vadd.f32 %v314_v47, %v189_v41  ;;  %705 = vmatprep.mubr.bf16.mxu0 %v446_v44  ;;  %v198_v44 = vmul.f32 %v1515_v29, %v1545_v59 }
  0xf5   :  { %v389_v50 = vadd.f32 %v1530_v36, %v313_v46  ;;  %706 = vmatmul.mubr.bf16.gmra.mrb[36].mxu0 %v445_v40  ;;  %v419_v53 = vmax.f32 %v387_v45, 0.0  ;;  %v199_v46 = vmul.f32 %v1518_v30, %v1545_v59 }
  0xf6   :  { %v390_v51 = vadd.f32 %v1535_v39, %v315_v49  ;;  %v420_v56 = vmax.f32 %v388_v48, 0.0 }
  0xf7   :  { %v421_v54 = vmax.f32 %v389_v50, 0.0  ;;  %v200_v50 = vmul.f32 %v1515_v29, %v1549_v4 }
  0xf8   :  { %v422_v57 = vmax.f32 %v390_v51, 0.0  ;;  %v318_v58 = vpop.f32.mrb[12].mxu0 }
  0xf9   :  { %v319_v61 = vadd.f32 %v318_v58, %v190_v52  ;;  %v320_v62 = vpop.f32.mrb[13].mxu0  ;;  %v447_v63 = vpack.c.bf16 %v421_v54, %v419_v53  ;;  %v201_v54 = vmul.f32 %v1518_v30, %v1549_v4 }
  0xfa   :  { %v321_v1 = vadd.f32 %v320_v62, %v191_v55  ;;  %v322_v2 = vpop.f32.mrb[14].mxu0  ;;  %v448_v3 = vpack.c.bf16 %v422_v57, %v420_v56 }
  0xfb   :  { %v391_v6 = vadd.f32 %v1530_v36, %v319_v61  ;;  %v323_v7 = vadd.f32 %v322_v2, %v192_v60  ;;  %v324_v8 = vpop.f32.mrb[15].mxu0 }
  0xfc   :  { %v325_v20 = vadd.f32 %v324_v8, %v193_v0  ;;  %715 = vmatprep.mubr.bf16.mxu0 %v448_v3  ;;  %v392_v9 = vadd.f32 %v1535_v39, %v321_v1  ;;  %v142_v0 = vpop.permute.xlu0 %141 }
  0xfd   :  { %v393_v10 = vadd.f32 %v1530_v36, %v323_v7  ;;  %716 = vmatmul.mubr.bf16.gmra.mrb[40].mxu0 %v447_v63  ;;  %v423_v26 = vmax.f32 %v391_v6, 0.0  ;;  %v202_v2 = vmul.f32 %v1515_v29, %v142_v0  ;;  %v203_v6 = vmul.f32 %v1518_v30, %v142_v0  ;;  %v147_v7 = vpop.permute.xlu1 %146 }
  0xfe   :  { %v394_v11 = vadd.f32 %v1535_v39, %v325_v20  ;;  %v424_v15 = vmax.f32 %v392_v9, 0.0 }
  0xff   :  { %v425_v12 = vmax.f32 %v393_v10, 0.0  ;;  %v204_v10 = vmul.f32 %v1515_v29, %v147_v7 }
 0x100   :  { %v328_v14 = vpop.f32.mrb[16].mxu0  ;;  %v426_v16 = vmax.f32 %v394_v11, 0.0 }
 0x101   :  { %v329_v21 = vadd.f32 %v328_v14, %v194_v5  ;;  %v330_v23 = vpop.f32.mrb[17].mxu0  ;;  %v449_v25 = vpack.c.bf16 %v425_v12, %v423_v26  ;;  %v205_v12 = vmul.f32 %v1518_v30, %v147_v7 }
 0x102   :  { %v331_v28 = vadd.f32 %v330_v23, %v195_v13  ;;  %v332_v32 = vpop.f32.mrb[18].mxu0  ;;  %v450_v34 = vpack.c.bf16 %v426_v16, %v424_v15  ;;  %v152_v23 = vpop.permute.xlu0 %151 }
 0x103   :  { %v395_v37 = vadd.f32 %v1530_v36, %v329_v21  ;;  %v333_v38 = vadd.f32 %v332_v32, %v196_v19  ;;  %v334_v40 = vpop.f32.mrb[19].mxu0  ;;  %v157_v32 = vpop.permute.xlu1 %156 }
 0x104   :  { %v396_v31 = vadd.f32 %v1535_v39, %v331_v28  ;;  %v335_v41 = vadd.f32 %v334_v40, %v197_v27  ;;  %725 = vmatprep.mubr.bf16.mxu1 %v450_v34 }
 0x105   :  { %v397_v42 = vadd.f32 %v1530_v36, %v333_v38  ;;  %726 = vmatmul.mubr.bf16.vlgmr.msra.gmra.mrb[0].mxu1 %v449_v25  ;;  %v427_v35 = vmax.f32 %v395_v37, 0.0  ;;  %v206_v37 = vmul.f32 %v1515_v29, %v152_v23 }
 0x106   :  { %v398_v43 = vadd.f32 %v1535_v39, %v335_v41  ;;  %v428_v47 = vmax.f32 %v396_v31, 0.0  ;;  %v207_v31 = vmul.f32 %v1518_v30, %v152_v23 }
 0x107   :  { %v429_v45 = vmax.f32 %v397_v42, 0.0 }
 0x108   :  { %v430_v48 = vmax.f32 %v398_v43, 0.0  ;;  %v338_v49 = vpop.f32.mrb[20].mxu0 }
 0x109   :  { %v339_v51 = vadd.f32 %v338_v49, %v198_v44  ;;  %v340_v52 = vpop.f32.mrb[21].mxu0  ;;  %v451_v53 = vpack.c.bf16 %v429_v45, %v427_v35  ;;  %v208_v44 = vmul.f32 %v1515_v29, %v157_v32 }
 0x10a   :  { %v341_v55 = vadd.f32 %v340_v52, %v199_v46  ;;  %v342_v56 = vpop.f32.mrb[22].mxu0  ;;  %v452_v57 = vpack.c.bf16 %v430_v48, %v428_v47  ;;  %v209_v47 = vmul.f32 %v1518_v30, %v157_v32 }
 0x10b   :  { %v399_v58 = vadd.f32 %v1530_v36, %v339_v51  ;;  %v343_v60 = vadd.f32 %v342_v56, %v200_v50  ;;  %v344_v61 = vpop.f32.mrb[23].mxu0 }
 0x10c   :  { %v400_v59 = vadd.f32 %v1535_v39, %v341_v55  ;;  %v345_v62 = vadd.f32 %v344_v61, %v201_v54  ;;  %735 = vmatprep.mubr.bf16.mxu1 %v452_v57 }
 0x10d   :  { %v401_v63 = vadd.f32 %v1530_v36, %v343_v60  ;;  %736 = vmatmul.mubr.bf16.gmra.mrb[4].mxu1 %v451_v53  ;;  %v431_v4 = vmax.f32 %v399_v58, 0.0 }
 0x10e   :  { %v402_v1 = vadd.f32 %v1535_v39, %v345_v62  ;;  %v432_v8 = vmax.f32 %v400_v59, 0.0  ;;  %v808_v62 = vld [vmem:[%s1775_s7] sm:$0x3] }
 0x10f   :  { %v433_v3 = vmax.f32 %v401_v63, 0.0  ;;  %v809_v63 = vunpack.c.l.bf16 %v808_v62 }
 0x110   :  { %v434_v20 = vmax.f32 %v402_v1, 0.0  ;;  %v348_v9 = vpop.f32.mrb[24].mxu0 }
 0x111   :  { %v349_v11 = vadd.f32 %v348_v9, %v202_v2  ;;  %v350_v5 = vpop.f32.mrb[25].mxu0  ;;  %v453_v26 = vpack.c.bf16 %v433_v3, %v431_v4  ;;  %v818_v2 = vrot.slane %v809_v63, %v166_v24 }
 0x112   :  { %v351_v13 = vadd.f32 %v350_v5, %v203_v6  ;;  %v352_v14 = vpop.f32.mrb[26].mxu0  ;;  %v454_v15 = vpack.c.bf16 %v434_v20, %v432_v8 }
 0x113   :  { %v403_v16 = vadd.f32 %v1530_v36, %v349_v11  ;;  %v353_v19 = vadd.f32 %v352_v14, %v204_v10  ;;  %v354_v21 = vpop.f32.mrb[27].mxu0  ;;  %v1637_v20 = vrot.slane %v818_v2, %v1506_v22 }
 0x114   :  { %v404_v25 = vadd.f32 %v1535_v39, %v351_v13  ;;  %v355_v27 = vadd.f32 %v354_v21, %v205_v12  ;;  %745 = vmatprep.mubr.bf16.mxu1 %v454_v15 }
 0x115   :  { %v405_v28 = vadd.f32 %v1530_v36, %v353_v19  ;;  %746 = vmatmul.mubr.bf16.gmra.mrb[8].mxu1 %v453_v26  ;;  %v435_v38 = vmax.f32 %v403_v16, 0.0 }
 0x116   :  { %v406_v34 = vadd.f32 %v1535_v39, %v355_v27  ;;  %v436_v41 = vmax.f32 %v404_v25, 0.0 }
 0x117   :  { %v437_v40 = vmax.f32 %v405_v28, 0.0 }
 0x118   :  { %v438_v42 = vmax.f32 %v406_v34, 0.0  ;;  %v358_v43 = vpop.f32.mrb[28].mxu0 }
 0x119   :  { %v359_v35 = vadd.f32 %v358_v43, %v206_v37  ;;  %v360_v45 = vpop.f32.mrb[29].mxu0  ;;  %v455_v46 = vpack.c.bf16 %v437_v40, %v435_v38 }
 0x11a   :  { %v361_v48 = vadd.f32 %v360_v45, %v207_v31  ;;  %v362_v49 = vpop.f32.mrb[30].mxu0  ;;  %v456_v50 = vpack.c.bf16 %v438_v42, %v436_v41 }
 0x11b   :  { %v407_v51 = vadd.f32 %v1530_v36, %v359_v35  ;;  %v363_v52 = vadd.f32 %v362_v49, %v208_v44  ;;  %v364_v53 = vpop.f32.mrb[31].mxu0 }
 0x11c   :  { %v408_v54 = vadd.f32 %v1535_v39, %v361_v48  ;;  %v365_v55 = vadd.f32 %v364_v53, %v209_v47  ;;  %755 = vmatprep.mubr.bf16.mxu1 %v456_v50 }
 0x11d   :  { %v409_v56 = vadd.f32 %v1530_v36, %v363_v52  ;;  %756 = vmatmul.mubr.bf16.gmra.mrb[12].mxu1 %v455_v46  ;;  %v439_v57 = vmax.f32 %v407_v51, 0.0  ;;  %v491_v36 = vld [vmem:[%s1774_s6] sm:$0x3]  ;;  %s1230_s6 = smov [#allocation3]  }
 0x11e   :  { %v410_v29 = vadd.f32 %v1535_v39, %v365_v55  ;;  %v440_v60 = vmax.f32 %v408_v54, 0.0  ;;  %v1622_v0 = vrot.slane %v491_v36, %v1506_v22  ;;  %v814_v39 = vrot.slane %v809_v63, %v1506_v22  ;;  %s1070_s7 = sshll.u32 %s1230_s6, 4  ;;  %s1071_s7 = int_to_ptr.vmem [resolvable:$true] %s1070_s7 }
 0x11f   :  { %v441_v58 = vmax.f32 %v409_v56, 0.0  ;;  %v1627_v1 = vrot.slane %v491_v36, %v375_v33  ;;  %s1204_s25 = scalar_lea.vmem %s1071_s7, 16  ;;  %s1208_s26 = scalar_lea.vmem %s1071_s7, 32 }
 0x120   :  { %v442_v30 = vmax.f32 %v410_v29, 0.0  ;;  %v1633_v6 = vrot.slane %v814_v39, %v1506_v22  ;;  %p1205_p0 = scmp.ne.s32.totalorder %s1071_s7, %s1204_s25  ;;  %p1209_p1 = scmp.lt.s32.totalorder %s1071_s7, %s1071_s7 }
 0x121   :  { %v457_v61 = vpack.c.bf16 %v441_v58, %v439_v57  ;;  %p1210_p2 = scmp.lt.s32.totalorder %s1208_s26, %s1204_s25 }
 0x122   :  { %v458_v59 = vpack.c.bf16 %v442_v30, %v440_v60 }
 0x123   :  { %p1211_p3 = por %p1210_p2, %p1209_p1 }
 0x124   :  { %765 = vmatprep.mubr.bf16.mxu1 %v458_v59 }
 0x125   :  { %766 = vmatmul.mubr.bf16.gmra.mrb[16].mxu1 %v457_v61  ;;  %p1212_p4 = pnand %p1211_p3, %p1205_p0 }
 0x1c0   :  { %v697_v4 = vpop.f32.mrb[32].mxu0 }
 0x1c1   :  { %v698_v3 = vadd.f32 %v697_v4, %v1622_v0  ;;  %v699_v7 = vpop.f32.mrb[33].mxu0 }
 0x1c2   :  { %v700_v8 = vadd.f32 %v699_v7, %v1627_v1  ;;  %v701_v9 = vpop.f32.mrb[34].mxu0 }
 0x1c3   :  { %v776_v10 = vmax.f32 %v698_v3, 0.0  ;;  %v702_v33 = vadd.f32 %v701_v9, %v1622_v0  ;;  %v703_v11 = vpop.f32.mrb[35].mxu0 }
 0x1c4   :  { %v777_v5 = vmax.f32 %v700_v8, 0.0  ;;  %v704_v24 = vadd.f32 %v703_v11, %v1627_v1 }
 0x1c5   :  { %v829_v26 = vmul.f32 %v1633_v6, %v776_v10  ;;  %v778_v12 = vmax.f32 %v702_v33, 0.0 }
 0x1c6   :  { %v830_v13 = vmul.f32 %v1637_v20, %v777_v5  ;;  %v779_v14 = vmax.f32 %v704_v24, 0.0 }
 0x1c7   :  { %v831_v15 = vmul.f32 %v1633_v6, %v778_v12 }
 0x1c8   :  { %v832_v16 = vmul.f32 %v1637_v20, %v779_v14  ;;  %v707_v19 = vpop.f32.mrb[36].mxu0  ;;  %v861_v21 = vadd.f32 %v830_v13, %v829_v26 }
 0x1c9   :  { %v708_v23 = vadd.f32 %v707_v19, %v1622_v0  ;;  %v709_v25 = vpop.f32.mrb[37].mxu0 }
 0x1ca   :  { %v710_v27 = vadd.f32 %v709_v25, %v1627_v1  ;;  %v711_v28 = vpop.f32.mrb[38].mxu0  ;;  %862 = vadd.xlane.f32.xlu0 %v861_v21  ;;  %v864_v32 = vadd.f32 %v832_v16, %v831_v15 }
 0x1cb   :  { %v780_v34 = vmax.f32 %v708_v23, 0.0  ;;  %v712_v37 = vadd.f32 %v711_v28, %v1622_v0  ;;  %v713_v38 = vpop.f32.mrb[39].mxu0 }
 0x1cc   :  { %v781_v40 = vmax.f32 %v710_v27, 0.0  ;;  %v714_v31 = vadd.f32 %v713_v38, %v1627_v1  ;;  %865 = vadd.xlane.f32.xlu1 %v864_v32 }
 0x1cd   :  { %v833_v41 = vmul.f32 %v1633_v6, %v780_v34  ;;  %v782_v42 = vmax.f32 %v712_v37, 0.0 }
 0x1ce   :  { %v834_v43 = vmul.f32 %v1637_v20, %v781_v40  ;;  %v783_v44 = vmax.f32 %v714_v31, 0.0 }
 0x1cf   :  { %v835_v35 = vmul.f32 %v1633_v6, %v782_v42 }
 0x1d0   :  { %v836_v45 = vmul.f32 %v1637_v20, %v783_v44  ;;  %v717_v46 = vpop.f32.mrb[40].mxu0  ;;  %v867_v47 = vadd.f32 %v834_v43, %v833_v41 }
 0x1d1   :  { %v718_v48 = vadd.f32 %v717_v46, %v1622_v0  ;;  %v719_v49 = vpop.f32.mrb[41].mxu0 }
 0x1d2   :  { %v720_v50 = vadd.f32 %v719_v49, %v1627_v1  ;;  %v721_v51 = vpop.f32.mrb[42].mxu0  ;;  %868 = vadd.xlane.f32.xlu0 %v867_v47  ;;  %v870_v52 = vadd.f32 %v836_v45, %v835_v35 }
 0x1d3   :  { %v784_v53 = vmax.f32 %v718_v48, 0.0  ;;  %v722_v54 = vadd.f32 %v721_v51, %v1622_v0  ;;  %v723_v55 = vpop.f32.mrb[43].mxu0 }
 0x1d4   :  { %v785_v56 = vmax.f32 %v720_v50, 0.0  ;;  %v724_v29 = vadd.f32 %v723_v55, %v1627_v1 }
 0x1d5   :  { %v837_v57 = vmul.f32 %v1633_v6, %v784_v53  ;;  %v786_v58 = vmax.f32 %v722_v54, 0.0 }
 0x1d6   :  { %v838_v60 = vmul.f32 %v1637_v20, %v785_v56  ;;  %v787_v30 = vmax.f32 %v724_v29, 0.0  ;;  %871 = vadd.xlane.f32.xlu0 %v870_v52 }
 0x1d7   :  { %v839_v61 = vmul.f32 %v1633_v6, %v786_v58 }
 0x1d8   :  { %v840_v59 = vmul.f32 %v1637_v20, %v787_v30  ;;  %v727_v62 = vpop.f32.mrb[0].mxu1  ;;  %v873_v63 = vadd.f32 %v838_v60, %v837_v57  ;;  %v909_v60 = vld [vmem:[#allocation2] sm:$0x1] }
 0x1d9   :  { %v728_v36 = vadd.f32 %v727_v62, %v1622_v0  ;;  %v729_v39 = vpop.f32.mrb[1].mxu1 }
 0x1da   :  { %v730_v2 = vadd.f32 %v729_v39, %v1627_v1  ;;  %v731_v4 = vpop.f32.mrb[2].mxu1  ;;  %874 = vadd.xlane.f32.xlu1 %v873_v63  ;;  %v876_v3 = vadd.f32 %v840_v59, %v839_v61 }
 0x1db   :  { %v788_v7 = vmax.f32 %v728_v36, 0.0  ;;  %v732_v8 = vadd.f32 %v731_v4, %v1622_v0  ;;  %v733_v9 = vpop.f32.mrb[3].mxu1 }
 0x1dc   :  { %v789_v10 = vmax.f32 %v730_v2, 0.0  ;;  %v734_v33 = vadd.f32 %v733_v9, %v1627_v1  ;;  %877 = vadd.xlane.f32.xlu0 %v876_v3 }
 0x1dd   :  { %v841_v11 = vmul.f32 %v1633_v6, %v788_v7  ;;  %v790_v5 = vmax.f32 %v732_v8, 0.0 }
 0x1de   :  { %v842_v24 = vmul.f32 %v1637_v20, %v789_v10  ;;  %v791_v26 = vmax.f32 %v734_v33, 0.0 }
 0x1df   :  { %v843_v12 = vmul.f32 %v1633_v6, %v790_v5 }
 0x1e0   :  { %v844_v13 = vmul.f32 %v1637_v20, %v791_v26  ;;  %v737_v14 = vpop.f32.mrb[4].mxu1  ;;  %v879_v15 = vadd.f32 %v842_v24, %v841_v11 }
 0x1e1   :  { %v738_v16 = vadd.f32 %v737_v14, %v1622_v0  ;;  %v739_v19 = vpop.f32.mrb[5].mxu1 }
 0x1e2   :  { %v740_v21 = vadd.f32 %v739_v19, %v1627_v1  ;;  %v741_v23 = vpop.f32.mrb[6].mxu1  ;;  %880 = vadd.xlane.f32.xlu1 %v879_v15  ;;  %v882_v25 = vadd.f32 %v844_v13, %v843_v12 }
 0x1e3   :  { %v792_v27 = vmax.f32 %v738_v16, 0.0  ;;  %v742_v28 = vadd.f32 %v741_v23, %v1622_v0  ;;  %v743_v32 = vpop.f32.mrb[7].mxu1 }
 0x1e4   :  { %v793_v34 = vmax.f32 %v740_v21, 0.0  ;;  %v744_v37 = vadd.f32 %v743_v32, %v1627_v1 }
 0x1e5   :  { %v845_v38 = vmul.f32 %v1633_v6, %v792_v27  ;;  %v794_v40 = vmax.f32 %v742_v28, 0.0 }
 0x1e6   :  { %v846_v31 = vmul.f32 %v1637_v20, %v793_v34  ;;  %v795_v41 = vmax.f32 %v744_v37, 0.0  ;;  %883 = vadd.xlane.f32.xlu1 %v882_v25 }
 0x1e7   :  { %v847_v42 = vmul.f32 %v1633_v6, %v794_v40 }
 0x1e8   :  { %v848_v43 = vmul.f32 %v1637_v20, %v795_v41  ;;  %v747_v44 = vpop.f32.mrb[8].mxu1  ;;  %v885_v35 = vadd.f32 %v846_v31, %v845_v38 }
 0x1e9   :  { %v748_v45 = vadd.f32 %v747_v44, %v1622_v0  ;;  %v749_v46 = vpop.f32.mrb[9].mxu1 }
 0x1ea   :  { %v750_v47 = vadd.f32 %v749_v46, %v1627_v1  ;;  %v751_v48 = vpop.f32.mrb[10].mxu1  ;;  %886 = vadd.xlane.f32.xlu1 %v885_v35  ;;  %v888_v49 = vadd.f32 %v848_v43, %v847_v42 }
 0x1eb   :  { %v796_v50 = vmax.f32 %v748_v45, 0.0  ;;  %v752_v51 = vadd.f32 %v751_v48, %v1622_v0  ;;  %v753_v52 = vpop.f32.mrb[11].mxu1 }
 0x1ec   :  { %v797_v53 = vmax.f32 %v750_v47, 0.0  ;;  %v754_v54 = vadd.f32 %v753_v52, %v1627_v1 }
 0x1ed   :  { %v849_v55 = vmul.f32 %v1633_v6, %v796_v50  ;;  %v798_v56 = vmax.f32 %v752_v51, 0.0 }
 0x1ee   :  { %v850_v29 = vmul.f32 %v1637_v20, %v797_v53  ;;  %v799_v57 = vmax.f32 %v754_v54, 0.0  ;;  %889 = vadd.xlane.f32.xlu1 %v888_v49  ;;  %v1702_v49 = vand.u32 127, %v160_v17 }
 0x1ef   :  { %v851_v58 = vmul.f32 %v1633_v6, %v798_v56 }
 0x1f0   :  { %v852_v30 = vmul.f32 %v1637_v20, %v799_v57  ;;  %v757_v61 = vpop.f32.mrb[12].mxu1  ;;  %v891_v59 = vadd.f32 %v850_v29, %v849_v55  ;;  %v957_v51 = vadd.s32 4294967288, %v1702_v49  ;;  %v964_v52 = vadd.s32 4294967280, %v1702_v49 }
 0x1f1   :  { %v758_v62 = vadd.f32 %v757_v61, %v1622_v0  ;;  %v759_v63 = vpop.f32.mrb[13].mxu1  ;;  %v955_v53 = vsub.s32 %v1702_v49, %v1498_v18 }
 0x1f2   :  { %v760_v36 = vadd.f32 %v759_v63, %v1627_v1  ;;  %v761_v39 = vpop.f32.mrb[14].mxu1  ;;  %892 = vadd.xlane.f32.xlu1 %v891_v59  ;;  %912 = vperm.xlu0 %1154, %v909_v60   ;;  %v894_v2 = vadd.f32 %v852_v30, %v851_v58  ;;  %v960_v54 = vsub.s32 %v957_v51, %v1498_v18  ;;  %v978_v30 = vadd.s32 4294967264, %v1702_v49 }
 0x1f3   :  { %v800_v4 = vmax.f32 %v758_v62, 0.0  ;;  %v762_v3 = vadd.f32 %v761_v39, %v1622_v0  ;;  %v763_v7 = vpop.f32.mrb[15].mxu1  ;;  %v967_v29 = vsub.s32 %v964_v52, %v1498_v18  ;;  %v985_v39 = vadd.s32 4294967256, %v1702_v49 }
 0x1f4   :  { %v801_v8 = vmax.f32 %v760_v36, 0.0  ;;  %v764_v9 = vadd.f32 %v763_v7, %v1627_v1  ;;  %v1055_v52 = vadd.s32 4294967176, %v1702_v49 }
 0x1f5   :  { %v853_v10 = vmul.f32 %v1633_v6, %v800_v4  ;;  %v802_v33 = vmax.f32 %v762_v3, 0.0 }
 0x1f6   :  { %v854_v11 = vmul.f32 %v1637_v20, %v801_v8  ;;  %v803_v5 = vmax.f32 %v764_v9, 0.0  ;;  %895 = vadd.xlane.f32.xlu1 %v894_v2  ;;  %v981_v2 = vsub.s32 %v978_v30, %v1498_v18  ;;  %v992_v8 = vadd.s32 4294967248, %v1702_v49 }
 0x1f7   :  { %v855_v24 = vmul.f32 %v1633_v6, %v802_v33  ;;  %v1058_v30 = vsub.s32 %v1055_v52, %v1498_v18 }
 0x1f8   :  { %v856_v26 = vmul.f32 %v1637_v20, %v803_v5  ;;  %v767_v12 = vpop.f32.mrb[16].mxu1  ;;  %v897_v13 = vadd.f32 %v854_v11, %v853_v10  ;;  %v988_v10 = vsub.s32 %v985_v39, %v1498_v18 }
 0x1f9   :  { %v768_v14 = vadd.f32 %v767_v12, %v1622_v0  ;;  %v769_v15 = vpop.f32.mrb[17].mxu1 }
 0x1fa   :  { %v770_v16 = vadd.f32 %v769_v15, %v1627_v1  ;;  %v771_v19 = vpop.f32.mrb[18].mxu1  ;;  %898 = vadd.xlane.f32.xlu1 %v897_v13  ;;  %v900_v21 = vadd.f32 %v856_v26, %v855_v24  ;;  %v999_v24 = vadd.s32 4294967240, %v1702_v49  ;;  %v995_v26 = vsub.s32 %v992_v8, %v1498_v18 }
 0x1fb   :  { %v804_v23 = vmax.f32 %v768_v14, 0.0  ;;  %v772_v25 = vadd.f32 %v771_v19, %v1622_v0  ;;  %v773_v27 = vpop.f32.mrb[19].mxu1  ;;  %v1006_v15 = vadd.s32 4294967232, %v1702_v49 }
 0x1fc   :  { %v805_v28 = vmax.f32 %v770_v16, 0.0  ;;  %v774_v32 = vadd.f32 %v773_v27, %v1627_v1  ;;  %v1002_v19 = vsub.s32 %v999_v24, %v1498_v18 }
 0x1fd   :  { %v857_v34 = vmul.f32 %v1633_v6, %v804_v23  ;;  %v806_v37 = vmax.f32 %v772_v25, 0.0  ;;  %v1013_v25 = vadd.s32 4294967224, %v1702_v49 }
 0x1fe   :  { %v858_v38 = vmul.f32 %v1637_v20, %v805_v28  ;;  %v807_v40 = vmax.f32 %v774_v32, 0.0  ;;  %v1020_v28 = vadd.s32 4294967216, %v1702_v49  ;;  %v1027_v32 = vadd.s32 4294967208, %v1702_v49 }
 0x1ff   :  { %v859_v31 = vmul.f32 %v1633_v6, %v806_v37  ;;  %v1009_v37 = vsub.s32 %v1006_v15, %v1498_v18 }
 0x200   :  { %v860_v41 = vmul.f32 %v1637_v20, %v807_v40  ;;  %v903_v42 = vadd.f32 %v858_v38, %v857_v34  ;;  %v1034_v40 = vadd.s32 4294967200, %v1702_v49 }
 0x202   :  { %904 = vadd.xlane.f32.xlu1 %v903_v42  ;;  %v906_v43 = vadd.f32 %v860_v41, %v859_v31  ;;  %v1016_v42 = vsub.s32 %v1013_v25, %v1498_v18 }
 0x206   :  { %907 = vadd.xlane.f32.xlu1 %v906_v43 }
 0x211   :  { %901 = vadd.xlane.f32.xlu0 %v900_v21 }
 0x257   :  { %v863_v0 = vpop.xlane.xlu0 %862 }
 0x259   :  { %v866_v44 = vpop.xlane.xlu1 %865 }
 0x25f   :  { %v869_v35 = vpop.xlane.xlu0 %868 }
 0x263   :  { %v872_v46 = vpop.xlane.xlu0 %871 }
 0x267   :  { %v875_v45 = vpop.xlane.xlu1 %874 }
 0x269   :  { %v878_v47 = vpop.xlane.xlu0 %877 }
 0x26f   :  { %v881_v1 = vpop.xlane.xlu1 %880 }
 0x271   :  { %v913_v50 = vpop.permute.xlu0 %912 }
 0x272   :  { %v1705_v20 = vrot.slane %v913_v50, %v1506_v22  ;;  %v971_v22 = vadd.s32 4294967272, %v1702_v49 }
 0x273   :  { %v884_v48 = vpop.xlane.xlu1 %883 }
 0x274   :  { %v919_v55 = vadd.f32 %v1705_v20, %v863_v0  ;;  %v920_v56 = vadd.f32 %v1705_v20, %v866_v44  ;;  %v921_v57 = vadd.f32 %v1705_v20, %v869_v35  ;;  %v974_v62 = vsub.s32 %v971_v22, %v1498_v18 }
 0x275   :  { %v922_v63 = vadd.f32 %v1705_v20, %v872_v46  ;;  %v923_v4 = vadd.f32 %v1705_v20, %v875_v45  ;;  %v924_v33 = vadd.f32 %v1705_v20, %v878_v47  ;;  %v925_v12 = vadd.f32 %v1705_v20, %v881_v1 }
 0x276   :  { %v956_v58 = vrot.slane %v919_v55, %v955_v53  ;;  %v961_v60 = vrot.slane %v920_v56, %v960_v54  ;;  %v968_v61 = vrot.slane %v921_v57, %v967_v29  ;;  %v926_v21 = vadd.f32 %v1705_v20, %v884_v48 }
 0x277   :  { %v887_v6 = vpop.xlane.xlu1 %886  ;;  %v975_v7 = vrot.slane %v922_v63, %v974_v62  ;;  %v982_v5 = vrot.slane %v923_v4, %v981_v2  ;;  %v989_v14 = vrot.slane %v924_v33, %v988_v10  ;;  %v996_v27 = vrot.slane %v925_v12, %v995_v26 }
 0x278   :  { %v963_v36 = vsel %vm962_vm3, %v961_v60, %v956_v58  ;;  %v927_v38 = vadd.f32 %v1705_v20, %v887_v6  ;;  %v1003_v41 = vrot.slane %v926_v21, %v1002_v19  ;;  %v1023_v0 = vsub.s32 %v1020_v28, %v1498_v18 }
 0x279   :  { %v970_v3 = vsel %vm969_vm4, %v968_v61, %v963_v36  ;;  %v1030_v45 = vsub.s32 %v1027_v32, %v1498_v18  ;;  %v1041_v46 = vadd.s32 4294967192, %v1702_v49  ;;  %v1037_v48 = vsub.s32 %v1034_v40, %v1498_v18 }
 0x27a   :  { %v977_v11 = vsel %vm976_vm5, %v975_v7, %v970_v3  ;;  %v1010_v47 = vrot.slane %v927_v38, %v1009_v37  ;;  %v1048_v6 = vadd.s32 4294967184, %v1702_v49 }
 0x27b   :  { %v890_v17 = vpop.xlane.xlu1 %889  ;;  %v984_v13 = vsel %vm983_vm6, %v982_v5, %v977_v11 }
 0x27c   :  { %v991_v23 = vsel %vm990_vm7, %v989_v14, %v984_v13  ;;  %v928_v43 = vadd.f32 %v1705_v20, %v890_v17  ;;  %v1044_v17 = vsub.s32 %v1041_v46, %v1498_v18  ;;  %v1051_v57 = vsub.s32 %v1048_v6, %v1498_v18 }
 0x27d   :  { %v998_v34 = vsel %vm997_vm8, %v996_v27, %v991_v23 }
 0x27e   :  { %v1005_v35 = vsel %vm1004_vm9, %v1003_v41, %v998_v34  ;;  %v1017_v51 = vrot.slane %v928_v43, %v1016_v42 }
 0x27f   :  { %v893_v59 = vpop.xlane.xlu1 %892  ;;  %v1012_v53 = vsel %vm1011_vm10, %v1010_v47, %v1005_v35 }
 0x280   :  { %v929_v44 = vadd.f32 %v1705_v20, %v893_v59  ;;  %v1019_v60 = vsel %vm1018_vm11, %v1017_v51, %v1012_v53 }
 0x282   :  { %v1024_v54 = vrot.slane %v929_v44, %v1023_v0 }
 0x283   :  { %v896_v9 = vpop.xlane.xlu1 %895 }
 0x284   :  { %v930_v1 = vadd.f32 %v1705_v20, %v896_v9  ;;  %v1026_v59 = vsel %vm1025_vm12, %v1024_v54, %v1019_v60 }
 0x286   :  { %v1031_v56 = vrot.slane %v930_v1, %v1030_v45 }
 0x287   :  { %v899_v16 = vpop.xlane.xlu1 %898 }
 0x288   :  { %v931_v50 = vadd.f32 %v1705_v20, %v899_v16  ;;  %v1033_v62 = vsel %vm1032_vm13, %v1031_v56, %v1026_v59 }
 0x28a   :  { %v1038_v29 = vrot.slane %v931_v50, %v1037_v48 }
 0x28c   :  { %v1040_v36 = vsel %vm1039_vm14, %v1038_v29, %v1033_v62 }
 0x28f   :  { %v905_v31 = vpop.xlane.xlu1 %904 }
 0x290   :  { %v933_v22 = vadd.f32 %v1705_v20, %v905_v31 }
 0x292   :  { %v1052_v39 = vrot.slane %v933_v22, %v1051_v57 }
 0x293   :  { %v908_v55 = vpop.xlane.xlu1 %907 }
 0x294   :  { %v934_v49 = vadd.f32 %v1705_v20, %v908_v55 }
 0x296   :  { %v1059_v2 = vrot.slane %v934_v49, %v1058_v30 }
 0x29e   :  { %v902_v58 = vpop.xlane.xlu0 %901 }
 0x29f   :  { %v932_v61 = vadd.f32 %v1705_v20, %v902_v58 }
 0x2a1   :  { %v1045_v63 = vrot.slane %v932_v61, %v1044_v17 }
 0x2a3   :  { %v1047_v4 = vsel %vm1046_vm15, %v1045_v63, %v1040_v36 }
 0x2a4   :  { %v1054_v3 = vsel %vm1053_vm0, %v1052_v39, %v1047_v4 }
 0x2a5   :  { %v1061_v18 = vsel %vm1060_vm1, %v1059_v2, %v1054_v3 }
 0x2a6   :  { %1063 = vst [vmem:[#allocation3] sm:$0x1] %v1061_v18 }
 0x2a7   :  { %1215 = shalt.err (!%p1212_p4)
}
 0x2a8   :  { %s1216_s29 = scalar_lea.hbm %s1777_s9, 16 }
 0x2a9   :  { %p1217_p5 = scmp.ne.s32.totalorder %s1777_s9, %s1216_s29  ;;  %p1220_p6 = scmp.lt.u32.totalorder %s1216_s29, %s1777_s9 }
 0x2ab   :  { %p1222_p7 = pnand %p1220_p6, %p1217_p5 }
 0x2ad   :  { %1225 = shalt.err (!%p1222_p7)
}
 0x2ae   :  { %1073 = dma.vmem_to_hbm [thread:$0]  %s1071_s7, 16, %s1777_s9, [#allocation4]  }
 0x2af   :  { %1226 = dma.done.wait [#allocation4], 16  }
 0x2b0   :  { %1227 = vsyncadd [#allocation4], 4294967280 }
 0x2b1   :  { %1077 = vsyncpa [#allocation4], 1 }

</bundles_post_ra>
